<compile_context>
chip_gen: v5e
topology: v5e:2x2
jax: 0.10.0
libtpu: 0.0.40
codegen_flags: <defaults>
</compile_context>

<pallas_src>
import jax
import jax.numpy as jnp
from jax.experimental import pallas as pl
from jax.experimental.pallas import tpu as pltpu


def _round_up(x, m):
    return ((x + m - 1) // m) * m


def _tpu_generation():
    """Best-effort TPU generation (4/5/6/7); 0 if unknown."""
    try:
        kind = jax.devices()[0].device_kind.lower()
    except Exception:
        return 0
    for g in (7, 6, 5, 4):
        if f"v{g}" in kind:
            return g
    return 0


def _vmem_capacity_bytes():
    """Per-TensorCore VMEM capacity; conservative 64 MiB (v7x) fallback."""
    try:
        cap = getattr(pltpu.get_tpu_info(), "vmem_capacity_bytes", None)
        if cap:
            return int(cap)
    except Exception:
        pass
    return 64 * 1024 * 1024


def _pick_tn(Dp, weight_budget_bytes):
    """Largest 128-multiple divisor of Dp whose (3*Dp, TN) bf16 weight fits."""
    cands = [t for t in range(Dp, 0, -128) if Dp % t == 0]
    for tn in cands:
        if 3 * Dp * tn * 2 <= weight_budget_bytes:
            return tn
    return 128


def _vmem_estimate(TL, Dp, TN, out_bytes, fuse_taps, w_bufs):
    bf16, f32 = 2, 4
    blocks = (2 * TL * Dp * bf16            # activation tile, double-buffered
              + 2 * 8 * Dp * bf16           # halo tile, double-buffered
              + w_bufs * 3 * Dp * TN * bf16 # weight tile(s)
              + w_bufs * TN * f32           # bias tile(s)
              + 2 * TL * TN * out_bytes)    # output tile, double-buffered
    temps = ((TL + 8) * Dp * bf16           # concat(tile, halo)
             + 2 * TL * Dp * bf16           # shifted slices
             + TL * TN * f32                # f32 accumulator
             + (TL * 3 * Dp * bf16 if fuse_taps else 0))
    return blocks + temps


def _make_kernel(TL, Dp, fuse_taps):
    def kernel(a_ref, h_ref, w_ref, b_ref, o_ref):
        # a_ref: (1, TL, Dp) bf16 -- padded-sequence rows [j*TL, j*TL + TL)
        # h_ref: (1, 8, Dp)  bf16 -- halo rows [(j+1)*TL, (j+1)*TL + 8)
        # w_ref: (3*Dp, TN)  bf16 -- row k*Dp + c, col o holds W[o, c, k]
        # b_ref: (1, TN)     f32
        # o_ref: (1, TL, TN)
        a = a_ref[0]                                          # (TL, Dp)
        full = jnp.concatenate([a, h_ref[0]], axis=0)         # (TL + 8, Dp)
        # Tap-k operand: row r holds x_pad[j*TL + r + k]  (k = 0, 1, 2).
        if fuse_taps:
            # Single K = 3*Dp contraction: fills 256-deep MXUs when Dp <= 128.
            xcat = jnp.concatenate(
                [a, full[1:TL + 1, :], full[2:TL + 2, :]], axis=1)  # (TL, 3*Dp)
            y = jnp.dot(xcat, w_ref[...], preferred_element_type=jnp.float32)
        else:
            y = (jnp.dot(a, w_ref[0:Dp, :],
                         preferred_element_type=jnp.float32)
                 + jnp.dot(full[1:TL + 1, :], w_ref[Dp:2 * Dp, :],
                           preferred_element_type=jnp.float32)
                 + jnp.dot(full[2:TL + 2, :], w_ref[2 * Dp:3 * Dp, :],
                           preferred_element_type=jnp.float32))
        o_ref[0] = (y + b_ref[...]).astype(o_ref.dtype)

    return kernel


def local_conv(x, weight, bias, *, out_dtype=None, max_tl=None):
    """Conv1d(d_model, d_model, k=3, padding=1) along the sequence axis.

    x: (B, L, D) ; weight: (D, D, 3) (PyTorch Conv1d layout) ; bias: (D,).
    Returns (B, L, D) in `out_dtype` (defaults to x.dtype; bf16 halves the
    output HBM stream).
    """
    B, L, D = x.shape
    out_dtype = x.dtype if out_dtype is None else out_dtype
    out_bytes = jnp.dtype(out_dtype).itemsize

    gen = _tpu_generation()
    vmem_cap = _vmem_capacity_bytes()
    # Leave >=16 MiB headroom for Mosaic internal scratch:
    # ~48 MiB on v7x (64 MiB/TC), ~110 MiB on v5e/v6e (128 MiB).
    vmem_budget = max(min(vmem_cap - (16 << 20), 110 << 20), 32 << 20)

    Dp = max(128, _round_up(D, 128))        # lane-dense channel dim
    # v5e/v4 MXUs are 128 deep: K = Dp already saturates them, so the 3-tap
    # fusion only pays for a (TL, 3*Dp) concat there.  Fuse on v6e/v7x only.
    fuse_taps = Dp <= 128 and gen not in (4, 5)

    # D_out tile: prefer TN = Dp (num_n = 1) so the activation is read once.
    TN = _pick_tn(Dp, (vmem_budget * 3) // 5)
    num_n = Dp // TN

    # Sequence tile: larger for small Dp (per-step payload vs fixed grid-step
    # overhead), clamped by the per-generation VMEM budget.
    if max_tl is None:
        max_tl = 2048 if Dp <= 256 else (1024 if Dp <= 512 else 512)
    TL = max(8, min(max_tl, _round_up(L, 8)))
    while TL > 8 and _vmem_estimate(TL, Dp, TN, out_bytes, fuse_taps, 1) > vmem_budget:
        TL = max(8, ((TL // 2) // 8) * 8)

    num_j = pl.cdiv(L, TL)
    Lp = num_j * TL + 8                     # only 8 extra rows: right pad + halo

    # Padded bf16 input: row 0 = left conv zero-pad, rows 1..L = x, rest zero.
    x_pad = jnp.zeros((B, Lp, Dp), jnp.bfloat16)
    x_pad = x_pad.at[:, 1:L + 1, :D].set(x.astype(jnp.bfloat16))

    # Conv1d weight (D_out, D_in, 3) -> (3*Dp, Dp): row k*Dp + c, col o = W[o, c, k].
    w_taps = jnp.stack([weight[:, :, k].T for k in range(3)], axis=0)   # (3, D, D)
    w = jnp.zeros((3, Dp, Dp), jnp.float32).at[:, :D, :D].set(w_taps)
    w = w.reshape(3 * Dp, Dp).astype(jnp.bfloat16)
    b2d = jnp.zeros((1, Dp), jnp.float32).at[0, :D].set(bias)

    # Request limit sized for the worst case (double-buffered weight fallback),
    # clamped to the per-generation budget.
    vmem_limit = int(min(
        max(_vmem_estimate(TL, Dp, TN, out_bytes, fuse_taps, 2) + (4 << 20),
            32 << 20),
        vmem_budget))

    cost = pl.CostEstimate(
        flops=2 * B * L * 3 * D * D,
        transcendentals=0,
        bytes_accessed=int(
            B * num_n * num_j * (TL + 8) * Dp * 2          # activation (+halo), re-read per D_out tile
            + B * num_n * (3 * Dp * TN * 2 + TN * 4)       # weight + bias
            + B * num_j * TL * Dp * out_bytes),            # output
    )

    kernel = _make_kernel(TL, Dp, fuse_taps)

    def _call(single_buffer_resident):
        if single_buffer_resident:
            # Weight/bias block index is constant along the inner j axis ->
            # a single buffer (no double-buffering) halves their resident VMEM.
            w_spec = pl.BlockSpec((3 * Dp, TN), lambda b, n, j: (0, n),
                                  pipeline_mode=pl.Buffered(1))
            b_spec = pl.BlockSpec((1, TN), lambda b, n, j: (0, n),
                                  pipeline_mode=pl.Buffered(1))
        else:
            w_spec = pl.BlockSpec((3 * Dp, TN), lambda b, n, j: (0, n))
            b_spec = pl.BlockSpec((1, TN), lambda b, n, j: (0, n))
        return pl.pallas_call(
            kernel,
            out_shape=jax.ShapeDtypeStruct((B, num_j * TL, Dp), out_dtype),
            # L tiles innermost + "arbitrary": weight stays resident across j,
            # and a v7x megacore split lands on B / D_out instead of j.
            grid=(B, num_n, num_j),
            in_specs=[
                pl.BlockSpec((1, TL, Dp), lambda b, n, j: (b, j, 0)),
                pl.BlockSpec((1, 8, Dp), lambda b, n, j: (b, (j + 1) * (TL // 8), 0)),
                w_spec,
                b_spec,
            ],
            out_specs=pl.BlockSpec((1, TL, TN), lambda b, n, j: (b, j, n)),
            compiler_params=pltpu.CompilerParams(
                dimension_semantics=("parallel", "parallel", "arbitrary"),
                vmem_limit_bytes=vmem_limit,
            ),
            cost_estimate=cost,
        )(x_pad, x_pad, w, b2d)

    try:
        out = _call(True)
    except Exception:
        # Fallback for jax versions without BlockSpec pipeline_mode support.
        out = _call(False)

    return out[:, :L, :D]


def local_conv_ref(x, weight, bias):
    """Pure-JAX f32 reference matching the PyTorch module exactly."""
    B, L, D = x.shape
    x_p = jnp.pad(x, ((0, 0), (1, 1), (0, 0)))
    y = jnp.zeros((B, L, D), jnp.float32)
    for k in range(3):
        y = y + jnp.einsum("blc,oc->blo", x_p[:, k:k + L, :], weight[:, :, k])
    return y + bias[None, None, :]


if __name__ == "__main__":
    B, L, D = 2, 8, 32   # batch, seq, d_model

    key = jax.random.PRNGKey(0)
    kx, kw, kb = jax.random.split(key, 3)

    # Deterministic synthetic parameters (Conv1d weight: (out, in, kernel=3)).
    fan_in = D * 3
    bound = 1.0 / (fan_in ** 0.5)
    weight = jax.random.uniform(kw, (D, D, 3), jnp.float32, -bound, bound)
    bias = jax.random.uniform(kb, (D,), jnp.float32, -bound, bound)
    x = jax.random.normal(kx, (B, L, D), jnp.float32)

    y = jax.block_until_ready(local_conv(x, weight, bias))
    assert y.shape == (B, L, D) and y.dtype == x.dtype

    # bf16-operand / f32-accumulate kernel vs pure-f32 reference: loose tolerance.
    y_ref_f32 = local_conv_ref(x, weight, bias)
    assert jnp.allclose(y, y_ref_f32, atol=1e-1, rtol=1e-1), "mismatch vs f32 reference"

    # Same reference on bf16-rounded inputs (kernel's compute precision): tight.
    y_ref_bf16 = local_conv_ref(
        x.astype(jnp.bfloat16).astype(jnp.float32),
        weight.astype(jnp.bfloat16).astype(jnp.float32),
        bias)
    assert jnp.allclose(y, y_ref_bf16, atol=1e-2, rtol=1e-2), "mismatch vs bf16 reference"

    # Optional bf16 output path (halves the output HBM stream).
    y_bf = jax.block_until_ready(local_conv(x, weight, bias, out_dtype=jnp.bfloat16))
    assert y_bf.dtype == jnp.bfloat16
    assert jnp.allclose(y_bf.astype(jnp.float32), y_ref_bf16, atol=5e-2, rtol=5e-2), \
        "mismatch vs bf16 reference (bf16 output)"

    print("KERNEL_OK")
</pallas_src>

<mosaic_0001>
module attributes {stable_mosaic.version = 11 : i64} {
  func.func @kernel(%arg0: i32, %arg1: i32, %arg2: i32, %arg3: memref<1x8x128xbf16, #tpu.memory_space<vmem>>, %arg4: memref<1x8x128xbf16, #tpu.memory_space<vmem>>, %arg5: memref<384x128xbf16, #tpu.memory_space<vmem>>, %arg6: memref<1x128xf32, #tpu.memory_space<vmem>>, %arg7: memref<1x8x128xf32, #tpu.memory_space<vmem>>) attributes {dimension_semantics = [#tpu.dimension_semantics<parallel>, #tpu.dimension_semantics<parallel>, #tpu.dimension_semantics<arbitrary>], iteration_bounds = array<i64: 2, 1, 1>, scalar_prefetch = 0 : i64, scratch_operands = 0 : i64, tpu.core_type = #tpu.core_type<tc>, window_params = [{transform_indices = @transform_0, window_bounds = array<i64: 1, 8, 128>}, {transform_indices = @transform_1, window_bounds = array<i64: 1, 8, 128>}, {pipeline_mode = #tpu.pipeline_mode<synchronous>, transform_indices = @transform_2, window_bounds = array<i64: 384, 128>}, {pipeline_mode = #tpu.pipeline_mode<synchronous>, transform_indices = @transform_3, window_bounds = array<i64: 1, 128>}, {transform_indices = @transform_4, window_bounds = array<i64: 1, 8, 128>}]} {
    %c0 = arith.constant 0 : index
    %c0_0 = arith.constant 0 : index
    %c0_1 = arith.constant 0 : index
    %0 = vector.load %arg3[%c0, %c0_0, %c0_1] : memref<1x8x128xbf16, #tpu.memory_space<vmem>>, vector<1x8x128xbf16>
    %1 = vector.shape_cast %0 : vector<1x8x128xbf16> to vector<8x128xbf16>
    %c0_2 = arith.constant 0 : index
    %c0_3 = arith.constant 0 : index
    %c0_4 = arith.constant 0 : index
    %2 = vector.load %arg4[%c0_2, %c0_3, %c0_4] : memref<1x8x128xbf16, #tpu.memory_space<vmem>>, vector<1x8x128xbf16>
    %3 = vector.shape_cast %2 : vector<1x8x128xbf16> to vector<8x128xbf16>
    %4 = tpu.concatenate %1, %3 in 0 : vector<8x128xbf16>, vector<8x128xbf16> -> vector<16x128xbf16>
    %5 = vector.extract_strided_slice %4 {offsets = [1, 0], sizes = [8, 128], strides = [1, 1]} : vector<16x128xbf16> to vector<8x128xbf16>
    %6 = vector.extract_strided_slice %4 {offsets = [2, 0], sizes = [8, 128], strides = [1, 1]} : vector<16x128xbf16> to vector<8x128xbf16>
    %7 = tpu.concatenate %1, %5, %6 in 1 : vector<8x128xbf16>, vector<8x128xbf16>, vector<8x128xbf16> -> vector<8x384xbf16>
    %c0_5 = arith.constant 0 : index
    %c0_6 = arith.constant 0 : index
    %8 = vector.load %arg5[%c0_5, %c0_6] : memref<384x128xbf16, #tpu.memory_space<vmem>>, vector<384x128xbf16>
    %cst = arith.constant dense<0.000000e+00> : vector<8x128xf32>
    %9 = tpu.matmul %7, %8, %cst {dimension_numbers = #tpu.dot_dimension_numbers<[1], [0], [0], [1], [0, 0, 1, 1], [], []>} : vector<8x384xbf16>, vector<384x128xbf16>, vector<8x128xf32> -> vector<8x128xf32>
    %c0_7 = arith.constant 0 : index
    %c0_8 = arith.constant 0 : index
    %10 = vector.load %arg6[%c0_7, %c0_8] : memref<1x128xf32, #tpu.memory_space<vmem>>, vector<1x128xf32>
    %11 = vector.broadcast %10 : vector<1x128xf32> to vector<8x128xf32>
    %12 = arith.addf %9, %11 : vector<8x128xf32>
    %c0_9 = arith.constant 0 : index
    %c0_10 = arith.constant 0 : index
    %c0_11 = arith.constant 0 : index
    %13 = vector.load %arg7[%c0_9, %c0_10, %c0_11] : memref<1x8x128xf32, #tpu.memory_space<vmem>>, vector<1x8x128xf32>
    %14 = vector.shape_cast %13 : vector<1x8x128xf32> to vector<8x128xf32>
    %15 = vector.shape_cast %12 : vector<8x128xf32> to vector<1x8x128xf32>
    tpu.vector_store %arg7[%c0_9, %c0_10, %c0_11], %15 {strides = array<i32>} : memref<1x8x128xf32, #tpu.memory_space<vmem>>, vector<1x8x128xf32>,
    return
  }
  func.func @transform_0(%arg0: i32, %arg1: i32, %arg2: i32) -> (i32, i32, i32) {
    %c0_i32 = arith.constant 0 : i32
    %c0_i32_0 = arith.constant 0 : i32
    return %arg0, %arg2, %c0_i32 : i32, i32, i32
  }
  func.func @transform_1(%arg0: i32, %arg1: i32, %arg2: i32) -> (i32, i32, i32) {
    %c1_i32 = arith.constant 1 : i32
    %0 = arith.addi %arg2, %c1_i32 : i32
    %c1_i32_0 = arith.constant 1 : i32
    %1 = arith.muli %0, %c1_i32_0 : i32
    %c0_i32 = arith.constant 0 : i32
    %c0_i32_1 = arith.constant 0 : i32
    return %arg0, %1, %c0_i32 : i32, i32, i32
  }
  func.func @transform_2(%arg0: i32, %arg1: i32, %arg2: i32) -> (i32, i32) {
    %c0_i32 = arith.constant 0 : i32
    %c0_i32_0 = arith.constant 0 : i32
    return %c0_i32, %arg1 : i32, i32
  }
  func.func @transform_3(%arg0: i32, %arg1: i32, %arg2: i32) -> (i32, i32) {
    %c0_i32 = arith.constant 0 : i32
    %c0_i32_0 = arith.constant 0 : i32
    return %c0_i32, %arg1 : i32, i32
  }
  func.func @transform_4(%arg0: i32, %arg1: i32, %arg2: i32) -> (i32, i32, i32) {
    %c0_i32 = arith.constant 0 : i32
    return %arg0, %arg2, %arg1 : i32, i32, i32
  }
}

module attributes {stable_mosaic.version = 11 : i64} {
  func.func @kernel(%arg0: i32, %arg1: i32, %arg2: i32, %arg3: memref<1x8x128xbf16, #tpu.memory_space<vmem>>, %arg4: memref<1x8x128xbf16, #tpu.memory_space<vmem>>, %arg5: memref<384x128xbf16, #tpu.memory_space<vmem>>, %arg6: memref<1x128xf32, #tpu.memory_space<vmem>>, %arg7: memref<1x8x128xf32, #tpu.memory_space<vmem>>) attributes {dimension_semantics = [#tpu.dimension_semantics<parallel>, #tpu.dimension_semantics<parallel>, #tpu.dimension_semantics<arbitrary>], iteration_bounds = array<i64: 2, 1, 1>, scalar_prefetch = 0 : i64, scratch_operands = 0 : i64, tpu.core_type = #tpu.core_type<tc>, window_params = [{transform_indices = @transform_0, window_bounds = array<i64: 1, 8, 128>}, {transform_indices = @transform_1, window_bounds = array<i64: 1, 8, 128>}, {transform_indices = @transform_2, window_bounds = array<i64: 384, 128>}, {transform_indices = @transform_3, window_bounds = array<i64: 1, 128>}, {transform_indices = @transform_4, window_bounds = array<i64: 1, 8, 128>}]} {
    %c0 = arith.constant 0 : index
    %c0_0 = arith.constant 0 : index
    %c0_1 = arith.constant 0 : index
    %0 = vector.load %arg3[%c0, %c0_0, %c0_1] : memref<1x8x128xbf16, #tpu.memory_space<vmem>>, vector<1x8x128xbf16>
    %1 = vector.shape_cast %0 : vector<1x8x128xbf16> to vector<8x128xbf16>
    %c0_2 = arith.constant 0 : index
    %c0_3 = arith.constant 0 : index
    %c0_4 = arith.constant 0 : index
    %2 = vector.load %arg4[%c0_2, %c0_3, %c0_4] : memref<1x8x128xbf16, #tpu.memory_space<vmem>>, vector<1x8x128xbf16>
    %3 = vector.shape_cast %2 : vector<1x8x128xbf16> to vector<8x128xbf16>
    %4 = tpu.concatenate %1, %3 in 0 : vector<8x128xbf16>, vector<8x128xbf16> -> vector<16x128xbf16>
    %5 = vector.extract_strided_slice %4 {offsets = [1, 0], sizes = [8, 128], strides = [1, 1]} : vector<16x128xbf16> to vector<8x128xbf16>
    %6 = vector.extract_strided_slice %4 {offsets = [2, 0], sizes = [8, 128], strides = [1, 1]} : vector<16x128xbf16> to vector<8x128xbf16>
    %7 = tpu.concatenate %1, %5, %6 in 1 : vector<8x128xbf16>, vector<8x128xbf16>, vector<8x128xbf16> -> vector<8x384xbf16>
    %c0_5 = arith.constant 0 : index
    %c0_6 = arith.constant 0 : index
    %8 = vector.load %arg5[%c0_5, %c0_6] : memref<384x128xbf16, #tpu.memory_space<vmem>>, vector<384x128xbf16>
    %cst = arith.constant dense<0.000000e+00> : vector<8x128xf32>
    %9 = tpu.matmul %7, %8, %cst {dimension_numbers = #tpu.dot_dimension_numbers<[1], [0], [0], [1], [0, 0, 1, 1], [], []>} : vector<8x384xbf16>, vector<384x128xbf16>, vector<8x128xf32> -> vector<8x128xf32>
    %c0_7 = arith.constant 0 : index
    %c0_8 = arith.constant 0 : index
    %10 = vector.load %arg6[%c0_7, %c0_8] : memref<1x128xf32, #tpu.memory_space<vmem>>, vector<1x128xf32>
    %11 = vector.broadcast %10 : vector<1x128xf32> to vector<8x128xf32>
    %12 = arith.addf %9, %11 : vector<8x128xf32>
    %c0_9 = arith.constant 0 : index
    %c0_10 = arith.constant 0 : index
    %c0_11 = arith.constant 0 : index
    %13 = vector.load %arg7[%c0_9, %c0_10, %c0_11] : memref<1x8x128xf32, #tpu.memory_space<vmem>>, vector<1x8x128xf32>
    %14 = vector.shape_cast %13 : vector<1x8x128xf32> to vector<8x128xf32>
    %15 = vector.shape_cast %12 : vector<8x128xf32> to vector<1x8x128xf32>
    tpu.vector_store %arg7[%c0_9, %c0_10, %c0_11], %15 {strides = array<i32>} : memref<1x8x128xf32, #tpu.memory_space<vmem>>, vector<1x8x128xf32>,
    return
  }
  func.func @transform_0(%arg0: i32, %arg1: i32, %arg2: i32) -> (i32, i32, i32) {
    %c0_i32 = arith.constant 0 : i32
    %c0_i32_0 = arith.constant 0 : i32
    return %arg0, %arg2, %c0_i32 : i32, i32, i32
  }
  func.func @transform_1(%arg0: i32, %arg1: i32, %arg2: i32) -> (i32, i32, i32) {
    %c1_i32 = arith.constant 1 : i32
    %0 = arith.addi %arg2, %c1_i32 : i32
    %c1_i32_0 = arith.constant 1 : i32
    %1 = arith.muli %0, %c1_i32_0 : i32
    %c0_i32 = arith.constant 0 : i32
    %c0_i32_1 = arith.constant 0 : i32
    return %arg0, %1, %c0_i32 : i32, i32, i32
  }
  func.func @transform_2(%arg0: i32, %arg1: i32, %arg2: i32) -> (i32, i32) {
    %c0_i32 = arith.constant 0 : i32
    %c0_i32_0 = arith.constant 0 : i32
    return %c0_i32, %arg1 : i32, i32
  }
  func.func @transform_3(%arg0: i32, %arg1: i32, %arg2: i32) -> (i32, i32) {
    %c0_i32 = arith.constant 0 : i32
    %c0_i32_0 = arith.constant 0 : i32
    return %c0_i32, %arg1 : i32, i32
  }
  func.func @transform_4(%arg0: i32, %arg1: i32, %arg2: i32) -> (i32, i32, i32) {
    %c0_i32 = arith.constant 0 : i32
    return %arg0, %arg2, %arg1 : i32, i32, i32
  }
}

</mosaic_0001>

<bundles_post_ra>
// kernel: tpu_custom_call.1
= control target key start
LH: loop header
LB: loop body
LE: loop exit
PB: predicated region body
PF: predicated region fallthrough
CT: control target
= control target key end

     0   :  { %s1326_s0 = inlined_call_operand.hbm [shape: bf16[2,16,128], index: 0, kind: input, shape index: {}]   ;;  %s1327_s1 = inlined_call_operand.hbm [shape: bf16[2,16,128], index: 1, kind: input, shape index: {}]   ;;  %s1328_s2 = inlined_call_operand.hbm [shape: bf16[384,128], index: 2, kind: input, shape index: {}]   ;;  %s1329_s3 = inlined_call_operand.vmem [shape: f32[1,128], index: 3, kind: input, shape index: {}]   ;;  %s1330_s4 = inlined_call_operand.hbm [shape: f32[2,8,128], index: 4, kind: output, shape index: {}]  }
   0x1   :  { %1335 = sst [smem:[#allocation18_spill]] %s1328_s2 }
   0x2   :  { %9 = vsyncpa [#allocation3], 0 }
   0x3   :  { %11 = vsyncpa [#allocation3 + $0x1], 0 }
   0x4   :  { %12 = vsyncpa [#allocation6], 0 }
   0x5   :  { %14 = vsyncpa [#allocation6 + $0x1], 0 }
   0x6   :  { %15 = vsyncpa [#allocation4], 0 }
   0x7   :  { %17 = vsyncpa [#allocation4 + $0x1], 0  ;;  %s1167_s15 = smov 0   ;;  %s1169_s16 = smov 0  }
   0x8   :  { %s1171_s17 = smov 0   ;;  %s1173_s18 = smov 0  }
   0x9   :  { %s1175_s19 = smov 0   ;;  %s1177_s20 = smov 0  }
   0xa LB: > { %1336 = sst [smem:[#allocation13_spill]] %s1125_s17  ;;  %s1198_s21 = sadd.s32 4294967295, %s1137_s20   ;;  %s1137_s20 = sphi %s1177_s20, %s23_s20   ;;  %s1133_s19 = sphi %s1175_s19, %s1351_s19   ;;  %s1129_s18 = sphi %s1173_s18, %s1350_s18   ;;  %s1125_s17 = sphi %s1171_s17, %s1354_s17   ;;  %s1121_s16 = sphi %s1169_s16, %s1353_s16   ;;  %s1117_s15 = sphi %s1167_s15, %s1352_s15  }
   0xb   : > { %1337 = sst [smem:[#allocation14_spill]] %s1133_s19  ;;  %p735_p0 = scmp.ge.s32.totalorder %s1137_s20, 1 }
   0xc   : > { %p65_p1 = scmp.eq.s32.totalorder %s1198_s21, 0  ;;  %p187_p2 = scmp.lt.s32.totalorder %s1137_s20, 3 }
   0xd   : > { %s1338_s2 = sld [smem:[#allocation18_spill]]  ;;  %s1139_s26 = smov [#allocation7]  }
   0xe   : > { %p1206_p3 = pnand %p735_p0, %p187_p2  ;;  %s202_s27 = sshll.u32 %s1139_s26, 4  ;;  %s203_s27 = int_to_ptr.vmem [resolvable:$true] %s202_s27 }
   0xf   : > { %p738_p6 = scmp.ge.s32.totalorder %s1137_s20, 2  ;;  %s1140_s28 = smov 64  }
  0x10   : > { %p886_p4 = pneg %p1206_p3  ;;  %s1141_s29 = smov 4  }
  0x11   : > { %s734_s30 = sadd.s32 4294967294, %s1137_s20   ;;  %s42_s5 = sadd.s32 1, %s1133_s19 }
  0x12   : > { %p887_p5 = pnand %p886_p4, %p65_p1  ;;  %s51_s6 = sadd.s32 1, %s1125_s17 }
  0x13   : > { %s200_s24 = sshll.u32 %s1338_s2, 4  ;;  %p44_p7 = scmp.ge.s32.totalorder %s42_s5, 2  ;;  %s201_s24 = int_to_ptr.hbm [resolvable:$true] %s200_s24 }
  0x14   : > { %889 = dma.hbm_to_vmem [thread:$0]  (!%p887_p5), %s201_s24, 3072, %s203_s27, [#allocation6], %s1140_s28, %s1140_s28, %s1141_s29  }
  0x15   : > { %p58_p8 = scmp.ne.s32.totalorder %s1125_s17, %s1121_s16  ;;  %p59_p9 = scmp.eq.s32.totalorder %s1137_s20, 0 }
  0x16   : > { %p64_p10 = scmp.ne.s32.totalorder %s1121_s16, %s1117_s15  ;;  %s1356_s5 = smov (%p44_p7, %s42_s5), 0 }
  0x17   : > { %1340 = sst [smem:[#allocation15_spill]] %s1356_s5  ;;  %p1225_p11 = por %p59_p9, %p58_p8 }
  0x18   : > { %p1231_p12 = por %p65_p1, %p64_p10  ;;  %s46_s9 = ssub.s32 %s1133_s19, %s1356_s5 }
  0x19   : > { %p174_p13 = scmp.eq.s32.totalorder %s1198_s21, 1  ;;  %p49_p0 = scmp.eq.s32.totalorder %s46_s9, 0 }
  0x1a   : > { %p180_p2 = scmp.eq.s32.totalorder %s734_s30, 1  ;;  %p902_p5 = scmp.lt.s32.totalorder %s1137_s20, 2 }
  0x1b   : > { %p1238_p4 = por %p174_p13, %p58_p8  ;;  %s222_s13 = sand.u32 1, %s1125_s17  }
  0x1c   : > { %s1244_s11 = scalar_select %p49_p0, %s1125_s17, %s51_s6  }
  0x1d   : > { %p1246_p7 = por %p180_p2, %p64_p10  ;;  %s739_s14 = sshll.u32 %s222_s13, 2 }
  0x1e   : > { %1344 = sst [smem:[#allocation16_spill]] %s1244_s11  ;;  %s850_s22 = sshll.u32 %s1133_s19, 3 }
  0x1f   : > { %s1345_s12 = scalar_select %p1246_p7, 1, 0 }
  0x20   : > { %s232_s26 = scalar_lea.hbm %s1326_s0, %s850_s22  ;;  %s226_s27 = scalar_lea.vmem [#allocation2], %s739_s14 }
  0x21   : > { %1346 = sst [smem:[#allocation17_spill]] %s1345_s12  ;;  %s236_s28 = sshll.u32 %s226_s27, 4  ;;  %s237_s28 = int_to_ptr.vmem [resolvable:$true] %s236_s28 }
  0x22   : > { %s234_s29 = sshll.u32 %s232_s26, 4  ;;  %p891_p8 = pnand %p902_p5, %p1225_p11  ;;  %s235_s29 = int_to_ptr.hbm [resolvable:$true] %s234_s29 }
  0x23   : > { %s642_s9 = scalar_lea.hbm %s1327_s1, %s850_s22  ;;  %s243_s2 = sand.u32 1, %s1137_s20  }
  0x24   : > { %s223_s5 = scalar_lea.sflag [#allocation3], %s222_s13  ;;  %s643_s11 = scalar_lea.hbm %s642_s9, 4 }
  0x25   : > { %893 = dma.hbm_to_vmem [thread:$0]  (!%p891_p8), %s235_s29, 64, %s237_s28, %s223_s5  }
  0x26   : > { %s256_s19 = sshll.u32 %s643_s11, 4  ;;  %s247_s17 = scalar_lea.vmem [#allocation5], %s739_s14  ;;  %s257_s19 = int_to_ptr.hbm [resolvable:$true] %s256_s19 }
  0x27   : > { %s258_s12 = sshll.u32 %s247_s17, 4  ;;  %s244_s23 = scalar_lea.sflag [#allocation6], %s243_s2  ;;  %s259_s12 = int_to_ptr.vmem [resolvable:$true] %s258_s12 }
  0x28   : > { %896 = dma.hbm_to_vmem [thread:$0]  (!%p891_p8), %s257_s19, 64, %s259_s12, %s244_s23  }
  0x29   : > { %267 = sbr.rel (%p1206_p3) target bundleno = 226 (0xe2), region = 36  ;;  %s1264_s7 = sand.u32 (!%p1206_p3), 1, %s1121_s16  }
  0x2a   : > { %s746_s22 = sshll.u32 (!%p1206_p3), %s1264_s7, 2  ;;  %s270_s13 = scalar_lea.sflag (!%p1206_p3), [#allocation3], %s1264_s7 }
  0x2b   : > { %s1268_s5 = scalar_lea.vmem (!%p1206_p3), [#allocation2], %s746_s22 }
  0x2e   : > { %1100 = dma.done.wait (%p1231_p12), %s270_s13, 64  }
  0x2f   : > { %1102 = vsyncadd (%p1231_p12), %s270_s13, 4294967232  ;;  %s279_s2 = sand.u32 1, %s1198_s21   ;;  %s283_s19 = scalar_lea.vmem [#allocation5], %s746_s22 }
  0x30   : > { %s280_s17 = scalar_lea.sflag [#allocation6], %s279_s2 }
  0x31   : > { %1104 = dma.done.wait (%p1231_p12), %s280_s17, 64  }
  0x32   : > { %1106 = vsyncadd (%p1231_p12), %s280_s17, 4294967232 }
  0x33   : > { %1108 = dma.done.wait (%p65_p1), [#allocation6], 3072  }
  0x34   : > { %1110 = vsyncadd (%p65_p1), [#allocation6], 4294964224  ;;  %v859_v0 = vld [vmem:[#allocation7 + $0x38] sm:$0xff]  ;;  %v858_v3 = vld [vmem:[#allocation7 + $0x30] sm:$0xff]  ;;  %vm331_vm0 = vcmask 1043456   ;;  %s847_s8 = sshll.u32 %s1129_s18, 3 }
  0x35   : > { %v867_v1 = vld [vmem:[#allocation7 + $0x78] sm:$0xff]  ;;  %541 = vmatpush.bf16.msra.mxu0 %v859_v0  ;;  %v866_v4 = vld [vmem:[#allocation7 + $0x70] sm:$0xff]  ;;  %v857_v6 = vld [vmem:[#allocation7 + $0x28] sm:$0xff]  ;;  %s749_s11 = sshll.u32 %s1264_s7, 3  ;;  %s594_s24 = scalar_lea.hbm %s1330_s4, %s847_s8 }
  0x36   : > { %v875_v2 = vld [vmem:[#allocation7 + $0xb8] sm:$0xff]  ;;  %554 = vmatpush.bf16.msra.mxu1 %v867_v1  ;;  %v874_v5 = vld [vmem:[#allocation7 + $0xb0] sm:$0xff]  ;;  %v865_v7 = vld [vmem:[#allocation7 + $0x68] sm:$0xff]  ;;  %s321_s26 = scalar_lea.vmem [#allocation8], %s749_s11  ;;  %s598_s28 = sshll.u32 %s594_s24, 4  ;;  %s599_s28 = int_to_ptr.hbm [resolvable:$true] %s598_s28 }
  0x37   : > { %567 = vmatpush.bf16.msra.mxu2 %v875_v2  ;;  %v873_v8 = vld [vmem:[#allocation7 + $0xa8] sm:$0xff]  ;;  %v327_v9 = vld [vmem:[%s283_s19] sm:$0xf]  ;;  %v856_v10 = vld [vmem:[#allocation7 + $0x20] sm:$0xff]  ;;  %s596_s27 = sshll.u32 %s321_s26, 4  ;;  %s582_s18 = scalar_lea.sflag [#allocation4], %s1264_s7  ;;  %s597_s27 = int_to_ptr.vmem [resolvable:$true] %s596_s27 }
  0x38   : > { %v864_v11 = vld [vmem:[#allocation7 + $0x60] sm:$0xff]  ;;  %v329_v12 = vunpack.c.l.b16 %v327_v9  ;;  %v855_v14 = vld [vmem:[#allocation7 + $0x18] sm:$0xff]  ;;  %v326_v18 = vld [vmem:[%s1268_s5] sm:$0xf]  ;;  %s1061_s29 = sshra.s32 %s599_s28, 4  ;;  %s1067_s23 = scalar_lea.hbm %s1330_s4, 16  ;;  %s1062_s29 = int_to_ptr.hbm [resolvable:$true] %s1061_s29 }
  0x39   : > { %542 = vmatpush.bf16.msra.mxu0 %v858_v3  ;;  %v872_v13 = vld [vmem:[#allocation7 + $0xa0] sm:$0xff]  ;;  %v863_v15 = vld [vmem:[#allocation7 + $0x58] sm:$0xff]  ;;  %v854_v19 = vld [vmem:[#allocation7 + $0x10] sm:$0xff]  ;;  %s1063_s30 = scalar_lea.hbm %s1062_s29, 8  ;;  %p1068_p10 = scmp.lt.s32.totalorder %s1062_s29, %s1330_s4 }
  0x3a   : > { %555 = vmatpush.bf16.msra.mxu1 %v866_v4  ;;  %v330_v16 = vpack.c.b16 %v329_v12, %v329_v12  ;;  %v871_v17 = vld [vmem:[#allocation7 + $0x98] sm:$0xff]  ;;  %v862_v20 = vld [vmem:[#allocation7 + $0x50] sm:$0xff]  ;;  %v853_v24 = vld [vmem:[#allocation7 + $0x8] sm:$0xff]  ;;  %p1064_p1 = scmp.ne.s32.totalorder %s1062_s29, %s1063_s30  ;;  %p1069_p11 = scmp.lt.s32.totalorder %s1067_s23, %s1063_s30 }
  0x3b   : > { %568 = vmatpush.bf16.msra.mxu2 %v874_v5  ;;  %v870_v22 = vld [vmem:[#allocation7 + $0x90] sm:$0xff]  ;;  %v861_v25 = vld [vmem:[#allocation7 + $0x48] sm:$0xff]  ;;  %v852_v29 = vld [vmem:[#allocation7] sm:$0xff] }
  0x3c   : > { %v334_v21 = vsel %vm331_vm0, %v326_v18, %v330_v16  ;;  %v869_v26 = vld [vmem:[#allocation7 + $0x88] sm:$0xff]  ;;  %v860_v30 = vld [vmem:[#allocation7 + $0x40] sm:$0xff]  ;;  %v956_v34 = vld [vmem:[%s1329_s3] ss:$0 sm:$0xff]  ;;  %p1065_p3 = pnand %p1064_p1, %p1238_p4  ;;  %p1070_p12 = por %p1069_p11, %p1068_p10 }
  0x3d   : > { %543 = vmatpush.bf16.msra.mxu0 %v857_v6  ;;  %v337_v23 = vshll.u32 %v334_v21, 16  ;;  %v335_v27 = vshrl.u32 %v334_v21, 16  ;;  %v868_v31 = vld [vmem:[#allocation7 + $0x80] sm:$0xff]  ;;  %v343_v33 = vrot.slane %v334_v21, 1 }
  0x3e   : > { %556 = vmatpush.bf16.msra.mxu1 %v865_v7  ;;  %p1066_p9 = pneg %p1065_p3 }
  0x3f   : > { %569 = vmatpush.bf16.msra.mxu2 %v873_v8  ;;  %v339_v28 = vrot.slane %v337_v23, 1 }
  0x40   : > { %p1071_p13 = pnand %p1070_p12, %p1066_p9 }
  0x41   : > { %544 = vmatpush.bf16.msra.mxu0 %v856_v10  ;;  %v340_v32 = vor.u32 %v339_v28, %v335_v27 }
  0x42   : > { %557 = vmatpush.bf16.msra.mxu1 %v864_v11 }
  0x43   : > { %570 = vmatpush.bf16.msra.mxu2 %v872_v13 }
  0x45   : > { %545 = vmatpush.bf16.msra.mxu0 %v855_v14 }
  0x46   : > { %558 = vmatpush.bf16.msra.mxu1 %v863_v15 }
  0x47   : > { %571 = vmatpush.bf16.msra.mxu2 %v871_v17 }
  0x49   : > { %546 = vmatpush.bf16.msra.mxu0 %v854_v19 }
  0x4a   : > { %559 = vmatpush.bf16.msra.mxu1 %v862_v20 }
  0x4b   : > { %572 = vmatpush.bf16.msra.mxu2 %v870_v22 }
  0x4d   : > { %547 = vmatpush.bf16.msra.mxu0 %v853_v24 }
  0x4e   : > { %560 = vmatpush.bf16.msra.mxu1 %v861_v25 }
  0x4f   : > { %573 = vmatpush.bf16.msra.mxu2 %v869_v26 }
  0x51   : > { %548 = vmatpush.bf16.msra.mxu0 %v852_v29 }
  0x52   : > { %561 = vmatpush.bf16.msra.mxu1 %v860_v30 }
  0x53   : > { %574 = vmatpush.bf16.msra.mxu2 %v868_v31 }
  0x54   : > { %549 = vmatmul.bf16.vlgmr.msra.gmra.mxu0 %v326_v18 }
  0x55   : > { %562 = vmatmul.bf16.vlgmr.msra.gmra.mxu1 %v340_v32 }
  0x56   : > { %575 = vmatmul.bf16.vlgmr.msra.gmra.mxu2 %v343_v33 }
  0xd1   : > { %v550_v35 = vpop.f32.mrf.mxu0 }
  0xd2   : > { %v563_v36 = vpop.f32.mrf.mxu1  ;;  %v551_v37 = vadd.f32 %v956_v34, %v550_v35 }
  0xd4   : > { %v564_v38 = vadd.f32 %v563_v36, %v551_v37 }
  0xd9   : > { %v576_v39 = vpop.f32.mrf.mxu2  ;;  %v552_v41 = vpop.f32.mrf.mxu0 }
  0xda   : > { %v577_v40 = vadd.f32 %v576_v39, %v564_v38  ;;  %v565_v42 = vpop.f32.mrf.mxu1 }
  0xdc   : > { %580 = vst [vmem:[%s321_s26] sm:$0xff] %v577_v40 }
  0xdd   : > { %1074 = shalt.err (!%p1071_p13)
}
  0xde   : > { %884 = dma.vmem_to_hbm [thread:$0]  (%p1238_p4), %s597_s27, 128, %s599_s28, %s582_s18  }
  0xe1   : > { %v578_v43 = vpop.f32.mrf.mxu2 }
  0xe2 PF: > { %s610_s5 = sand.u32 1, %s1117_s15   ;;  %p898_p0 = pnand %p738_p6, %p1246_p7 }
  0xe3   : > { %s611_s2 = scalar_lea.sflag [#allocation4], %s610_s5 }
  0xe4   : > { %p899_p2 = pneg %p898_p0 }
  0xe6   : > { %1112 = dma.done.wait (%p899_p2), %s611_s2, 128  }
  0xe7   : > { %1114 = vsyncadd (%p899_p2), %s611_s2, 4294967168  ;;  %s23_s20 = sadd.s32 1, %s1137_s20   ;;  %s1348_s17 = sld [smem:[#allocation13_spill]] }
  0xe8   : > { %p20_p5 = scmp.ge.s32.totalorder %s23_s20, 4   ;;  %s1349_s10 = sld [smem:[#allocation16_spill]] }
  0xe9   : > { %s1350_s18 = sld [smem:[#allocation14_spill]]  ;;  %s1352_s15 = smov %s1121_s16 }
  0xea   : > { %s1351_s19 = sld [smem:[#allocation15_spill]]  ;;  %22 = sbr.rel (!%p20_p5) target bundleno = 10 (0xa), region = 102 }
  0xed   : > { %s1353_s16 = smov %s1348_s17 }
  0xee   : > { %s1354_s17 = smov %s1349_s10 }
  0xef   :  { %617 = vsyncpa [#allocation3], 1 }
  0xf0   :  { %619 = vsyncpa [#allocation3 + $0x1], 1 }
  0xf1   :  { %620 = vsyncpa [#allocation6], 1 }
  0xf2   :  { %622 = vsyncpa [#allocation6 + $0x1], 1 }
  0xf3   :  { %623 = vsyncpa [#allocation4], 1 }
  0xf4   :  { %625 = vsyncpa [#allocation4 + $0x1], 1 }

// kernel: tpu_custom_call.1
= control target key start
LH: loop header
LB: loop body
LE: loop exit
PB: predicated region body
PF: predicated region fallthrough
CT: control target
= control target key end

     0   :  { %s1326_s0 = inlined_call_operand.hbm [shape: bf16[2,16,128], index: 0, kind: input, shape index: {}]   ;;  %s1327_s1 = inlined_call_operand.hbm [shape: bf16[2,16,128], index: 1, kind: input, shape index: {}]   ;;  %s1328_s2 = inlined_call_operand.hbm [shape: bf16[384,128], index: 2, kind: input, shape index: {}]   ;;  %s1329_s3 = inlined_call_operand.vmem [shape: f32[1,128], index: 3, kind: input, shape index: {}]   ;;  %s1330_s4 = inlined_call_operand.hbm [shape: f32[2,8,128], index: 4, kind: output, shape index: {}]  }
   0x1   :  { %1335 = sst [smem:[#allocation18_spill]] %s1328_s2 }
   0x2   :  { %9 = vsyncpa [#allocation3], 0 }
   0x3   :  { %11 = vsyncpa [#allocation3 + $0x1], 0 }
   0x4   :  { %12 = vsyncpa [#allocation6], 0 }
   0x5   :  { %14 = vsyncpa [#allocation6 + $0x1], 0 }
   0x6   :  { %15 = vsyncpa [#allocation4], 0 }
   0x7   :  { %17 = vsyncpa [#allocation4 + $0x1], 0  ;;  %s1167_s15 = smov 0   ;;  %s1169_s16 = smov 0  }
   0x8   :  { %s1171_s17 = smov 0   ;;  %s1173_s18 = smov 0  }
   0x9   :  { %s1175_s19 = smov 0   ;;  %s1177_s20 = smov 0  }
   0xa LB: > { %1336 = sst [smem:[#allocation13_spill]] %s1125_s17  ;;  %s1198_s21 = sadd.s32 4294967295, %s1137_s20   ;;  %s1137_s20 = sphi %s1177_s20, %s23_s20   ;;  %s1133_s19 = sphi %s1175_s19, %s1351_s19   ;;  %s1129_s18 = sphi %s1173_s18, %s1350_s18   ;;  %s1125_s17 = sphi %s1171_s17, %s1354_s17   ;;  %s1121_s16 = sphi %s1169_s16, %s1353_s16   ;;  %s1117_s15 = sphi %s1167_s15, %s1352_s15  }
   0xb   : > { %1337 = sst [smem:[#allocation14_spill]] %s1133_s19  ;;  %p735_p0 = scmp.ge.s32.totalorder %s1137_s20, 1 }
   0xc   : > { %p65_p1 = scmp.eq.s32.totalorder %s1198_s21, 0  ;;  %p187_p2 = scmp.lt.s32.totalorder %s1137_s20, 3 }
   0xd   : > { %s1338_s2 = sld [smem:[#allocation18_spill]]  ;;  %s1139_s26 = smov [#allocation7]  }
   0xe   : > { %p1206_p3 = pnand %p735_p0, %p187_p2  ;;  %s202_s27 = sshll.u32 %s1139_s26, 4  ;;  %s203_s27 = int_to_ptr.vmem [resolvable:$true] %s202_s27 }
   0xf   : > { %p738_p6 = scmp.ge.s32.totalorder %s1137_s20, 2  ;;  %s1140_s28 = smov 64  }
  0x10   : > { %p886_p4 = pneg %p1206_p3  ;;  %s1141_s29 = smov 4  }
  0x11   : > { %s734_s30 = sadd.s32 4294967294, %s1137_s20   ;;  %s42_s5 = sadd.s32 1, %s1133_s19 }
  0x12   : > { %p887_p5 = pnand %p886_p4, %p65_p1  ;;  %s51_s6 = sadd.s32 1, %s1125_s17 }
  0x13   : > { %s200_s24 = sshll.u32 %s1338_s2, 4  ;;  %p44_p7 = scmp.ge.s32.totalorder %s42_s5, 2  ;;  %s201_s24 = int_to_ptr.hbm [resolvable:$true] %s200_s24 }
  0x14   : > { %889 = dma.hbm_to_vmem [thread:$0]  (!%p887_p5), %s201_s24, 3072, %s203_s27, [#allocation6], %s1140_s28, %s1140_s28, %s1141_s29  }
  0x15   : > { %p58_p8 = scmp.ne.s32.totalorder %s1125_s17, %s1121_s16  ;;  %p59_p9 = scmp.eq.s32.totalorder %s1137_s20, 0 }
  0x16   : > { %p64_p10 = scmp.ne.s32.totalorder %s1121_s16, %s1117_s15  ;;  %s1356_s5 = smov (%p44_p7, %s42_s5), 0 }
  0x17   : > { %1340 = sst [smem:[#allocation15_spill]] %s1356_s5  ;;  %p1225_p11 = por %p59_p9, %p58_p8 }
  0x18   : > { %p1231_p12 = por %p65_p1, %p64_p10  ;;  %s46_s9 = ssub.s32 %s1133_s19, %s1356_s5 }
  0x19   : > { %p174_p13 = scmp.eq.s32.totalorder %s1198_s21, 1  ;;  %p49_p0 = scmp.eq.s32.totalorder %s46_s9, 0 }
  0x1a   : > { %p180_p2 = scmp.eq.s32.totalorder %s734_s30, 1  ;;  %p902_p5 = scmp.lt.s32.totalorder %s1137_s20, 2 }
  0x1b   : > { %p1238_p4 = por %p174_p13, %p58_p8  ;;  %s222_s13 = sand.u32 1, %s1125_s17  }
  0x1c   : > { %s1244_s11 = scalar_select %p49_p0, %s1125_s17, %s51_s6  }
  0x1d   : > { %p1246_p7 = por %p180_p2, %p64_p10  ;;  %s739_s14 = sshll.u32 %s222_s13, 2 }
  0x1e   : > { %1344 = sst [smem:[#allocation16_spill]] %s1244_s11  ;;  %s850_s22 = sshll.u32 %s1133_s19, 3 }
  0x1f   : > { %s1345_s12 = scalar_select %p1246_p7, 1, 0 }
  0x20   : > { %s232_s26 = scalar_lea.hbm %s1326_s0, %s850_s22  ;;  %s226_s27 = scalar_lea.vmem [#allocation2], %s739_s14 }
  0x21   : > { %1346 = sst [smem:[#allocation17_spill]] %s1345_s12  ;;  %s236_s28 = sshll.u32 %s226_s27, 4  ;;  %s237_s28 = int_to_ptr.vmem [resolvable:$true] %s236_s28 }
  0x22   : > { %s234_s29 = sshll.u32 %s232_s26, 4  ;;  %p891_p8 = pnand %p902_p5, %p1225_p11  ;;  %s235_s29 = int_to_ptr.hbm [resolvable:$true] %s234_s29 }
  0x23   : > { %s642_s9 = scalar_lea.hbm %s1327_s1, %s850_s22  ;;  %s243_s2 = sand.u32 1, %s1137_s20  }
  0x24   : > { %s223_s5 = scalar_lea.sflag [#allocation3], %s222_s13  ;;  %s643_s11 = scalar_lea.hbm %s642_s9, 4 }
  0x25   : > { %893 = dma.hbm_to_vmem [thread:$0]  (!%p891_p8), %s235_s29, 64, %s237_s28, %s223_s5  }
  0x26   : > { %s256_s19 = sshll.u32 %s643_s11, 4  ;;  %s247_s17 = scalar_lea.vmem [#allocation5], %s739_s14  ;;  %s257_s19 = int_to_ptr.hbm [resolvable:$true] %s256_s19 }
  0x27   : > { %s258_s12 = sshll.u32 %s247_s17, 4  ;;  %s244_s23 = scalar_lea.sflag [#allocation6], %s243_s2  ;;  %s259_s12 = int_to_ptr.vmem [resolvable:$true] %s258_s12 }
  0x28   : > { %896 = dma.hbm_to_vmem [thread:$0]  (!%p891_p8), %s257_s19, 64, %s259_s12, %s244_s23  }
  0x29   : > { %267 = sbr.rel (%p1206_p3) target bundleno = 226 (0xe2), region = 36  ;;  %s1264_s7 = sand.u32 (!%p1206_p3), 1, %s1121_s16  }
  0x2a   : > { %s746_s22 = sshll.u32 (!%p1206_p3), %s1264_s7, 2  ;;  %s270_s13 = scalar_lea.sflag (!%p1206_p3), [#allocation3], %s1264_s7 }
  0x2b   : > { %s1268_s5 = scalar_lea.vmem (!%p1206_p3), [#allocation2], %s746_s22 }
  0x2e   : > { %1100 = dma.done.wait (%p1231_p12), %s270_s13, 64  }
  0x2f   : > { %1102 = vsyncadd (%p1231_p12), %s270_s13, 4294967232  ;;  %s279_s2 = sand.u32 1, %s1198_s21   ;;  %s283_s19 = scalar_lea.vmem [#allocation5], %s746_s22 }
  0x30   : > { %s280_s17 = scalar_lea.sflag [#allocation6], %s279_s2 }
  0x31   : > { %1104 = dma.done.wait (%p1231_p12), %s280_s17, 64  }
  0x32   : > { %1106 = vsyncadd (%p1231_p12), %s280_s17, 4294967232 }
  0x33   : > { %1108 = dma.done.wait (%p65_p1), [#allocation6], 3072  }
  0x34   : > { %1110 = vsyncadd (%p65_p1), [#allocation6], 4294964224  ;;  %v859_v0 = vld [vmem:[#allocation7 + $0x38] sm:$0xff]  ;;  %v858_v3 = vld [vmem:[#allocation7 + $0x30] sm:$0xff]  ;;  %vm331_vm0 = vcmask 1043456   ;;  %s847_s8 = sshll.u32 %s1129_s18, 3 }
  0x35   : > { %v867_v1 = vld [vmem:[#allocation7 + $0x78] sm:$0xff]  ;;  %541 = vmatpush.bf16.msra.mxu0 %v859_v0  ;;  %v866_v4 = vld [vmem:[#allocation7 + $0x70] sm:$0xff]  ;;  %v857_v6 = vld [vmem:[#allocation7 + $0x28] sm:$0xff]  ;;  %s749_s11 = sshll.u32 %s1264_s7, 3  ;;  %s594_s24 = scalar_lea.hbm %s1330_s4, %s847_s8 }
  0x36   : > { %v875_v2 = vld [vmem:[#allocation7 + $0xb8] sm:$0xff]  ;;  %554 = vmatpush.bf16.msra.mxu1 %v867_v1  ;;  %v874_v5 = vld [vmem:[#allocation7 + $0xb0] sm:$0xff]  ;;  %v865_v7 = vld [vmem:[#allocation7 + $0x68] sm:$0xff]  ;;  %s321_s26 = scalar_lea.vmem [#allocation8], %s749_s11  ;;  %s598_s28 = sshll.u32 %s594_s24, 4  ;;  %s599_s28 = int_to_ptr.hbm [resolvable:$true] %s598_s28 }
  0x37   : > { %567 = vmatpush.bf16.msra.mxu2 %v875_v2  ;;  %v873_v8 = vld [vmem:[#allocation7 + $0xa8] sm:$0xff]  ;;  %v327_v9 = vld [vmem:[%s283_s19] sm:$0xf]  ;;  %v856_v10 = vld [vmem:[#allocation7 + $0x20] sm:$0xff]  ;;  %s596_s27 = sshll.u32 %s321_s26, 4  ;;  %s582_s18 = scalar_lea.sflag [#allocation4], %s1264_s7  ;;  %s597_s27 = int_to_ptr.vmem [resolvable:$true] %s596_s27 }
  0x38   : > { %v864_v11 = vld [vmem:[#allocation7 + $0x60] sm:$0xff]  ;;  %v329_v12 = vunpack.c.l.b16 %v327_v9  ;;  %v855_v14 = vld [vmem:[#allocation7 + $0x18] sm:$0xff]  ;;  %v326_v18 = vld [vmem:[%s1268_s5] sm:$0xf]  ;;  %s1061_s29 = sshra.s32 %s599_s28, 4  ;;  %s1067_s23 = scalar_lea.hbm %s1330_s4, 16  ;;  %s1062_s29 = int_to_ptr.hbm [resolvable:$true] %s1061_s29 }
  0x39   : > { %542 = vmatpush.bf16.msra.mxu0 %v858_v3  ;;  %v872_v13 = vld [vmem:[#allocation7 + $0xa0] sm:$0xff]  ;;  %v863_v15 = vld [vmem:[#allocation7 + $0x58] sm:$0xff]  ;;  %v854_v19 = vld [vmem:[#allocation7 + $0x10] sm:$0xff]  ;;  %s1063_s30 = scalar_lea.hbm %s1062_s29, 8  ;;  %p1068_p10 = scmp.lt.s32.totalorder %s1062_s29, %s1330_s4 }
  0x3a   : > { %555 = vmatpush.bf16.msra.mxu1 %v866_v4  ;;  %v330_v16 = vpack.c.b16 %v329_v12, %v329_v12  ;;  %v871_v17 = vld [vmem:[#allocation7 + $0x98] sm:$0xff]  ;;  %v862_v20 = vld [vmem:[#allocation7 + $0x50] sm:$0xff]  ;;  %v853_v24 = vld [vmem:[#allocation7 + $0x8] sm:$0xff]  ;;  %p1064_p1 = scmp.ne.s32.totalorder %s1062_s29, %s1063_s30  ;;  %p1069_p11 = scmp.lt.s32.totalorder %s1067_s23, %s1063_s30 }
  0x3b   : > { %568 = vmatpush.bf16.msra.mxu2 %v874_v5  ;;  %v870_v22 = vld [vmem:[#allocation7 + $0x90] sm:$0xff]  ;;  %v861_v25 = vld [vmem:[#allocation7 + $0x48] sm:$0xff]  ;;  %v852_v29 = vld [vmem:[#allocation7] sm:$0xff] }
  0x3c   : > { %v334_v21 = vsel %vm331_vm0, %v326_v18, %v330_v16  ;;  %v869_v26 = vld [vmem:[#allocation7 + $0x88] sm:$0xff]  ;;  %v860_v30 = vld [vmem:[#allocation7 + $0x40] sm:$0xff]  ;;  %v956_v34 = vld [vmem:[%s1329_s3] ss:$0 sm:$0xff]  ;;  %p1065_p3 = pnand %p1064_p1, %p1238_p4  ;;  %p1070_p12 = por %p1069_p11, %p1068_p10 }
  0x3d   : > { %543 = vmatpush.bf16.msra.mxu0 %v857_v6  ;;  %v337_v23 = vshll.u32 %v334_v21, 16  ;;  %v335_v27 = vshrl.u32 %v334_v21, 16  ;;  %v868_v31 = vld [vmem:[#allocation7 + $0x80] sm:$0xff]  ;;  %v343_v33 = vrot.slane %v334_v21, 1 }
  0x3e   : > { %556 = vmatpush.bf16.msra.mxu1 %v865_v7  ;;  %p1066_p9 = pneg %p1065_p3 }
  0x3f   : > { %569 = vmatpush.bf16.msra.mxu2 %v873_v8  ;;  %v339_v28 = vrot.slane %v337_v23, 1 }
  0x40   : > { %p1071_p13 = pnand %p1070_p12, %p1066_p9 }
  0x41   : > { %544 = vmatpush.bf16.msra.mxu0 %v856_v10  ;;  %v340_v32 = vor.u32 %v339_v28, %v335_v27 }
  0x42   : > { %557 = vmatpush.bf16.msra.mxu1 %v864_v11 }
  0x43   : > { %570 = vmatpush.bf16.msra.mxu2 %v872_v13 }
  0x45   : > { %545 = vmatpush.bf16.msra.mxu0 %v855_v14 }
  0x46   : > { %558 = vmatpush.bf16.msra.mxu1 %v863_v15 }
  0x47   : > { %571 = vmatpush.bf16.msra.mxu2 %v871_v17 }
  0x49   : > { %546 = vmatpush.bf16.msra.mxu0 %v854_v19 }
  0x4a   : > { %559 = vmatpush.bf16.msra.mxu1 %v862_v20 }
  0x4b   : > { %572 = vmatpush.bf16.msra.mxu2 %v870_v22 }
  0x4d   : > { %547 = vmatpush.bf16.msra.mxu0 %v853_v24 }
  0x4e   : > { %560 = vmatpush.bf16.msra.mxu1 %v861_v25 }
  0x4f   : > { %573 = vmatpush.bf16.msra.mxu2 %v869_v26 }
  0x51   : > { %548 = vmatpush.bf16.msra.mxu0 %v852_v29 }
  0x52   : > { %561 = vmatpush.bf16.msra.mxu1 %v860_v30 }
  0x53   : > { %574 = vmatpush.bf16.msra.mxu2 %v868_v31 }
  0x54   : > { %549 = vmatmul.bf16.vlgmr.msra.gmra.mxu0 %v326_v18 }
  0x55   : > { %562 = vmatmul.bf16.vlgmr.msra.gmra.mxu1 %v340_v32 }
  0x56   : > { %575 = vmatmul.bf16.vlgmr.msra.gmra.mxu2 %v343_v33 }
  0xd1   : > { %v550_v35 = vpop.f32.mrf.mxu0 }
  0xd2   : > { %v563_v36 = vpop.f32.mrf.mxu1  ;;  %v551_v37 = vadd.f32 %v956_v34, %v550_v35 }
  0xd4   : > { %v564_v38 = vadd.f32 %v563_v36, %v551_v37 }
  0xd9   : > { %v576_v39 = vpop.f32.mrf.mxu2  ;;  %v552_v41 = vpop.f32.mrf.mxu0 }
  0xda   : > { %v577_v40 = vadd.f32 %v576_v39, %v564_v38  ;;  %v565_v42 = vpop.f32.mrf.mxu1 }
  0xdc   : > { %580 = vst [vmem:[%s321_s26] sm:$0xff] %v577_v40 }
  0xdd   : > { %1074 = shalt.err (!%p1071_p13)
}
  0xde   : > { %884 = dma.vmem_to_hbm [thread:$0]  (%p1238_p4), %s597_s27, 128, %s599_s28, %s582_s18  }
  0xe1   : > { %v578_v43 = vpop.f32.mrf.mxu2 }
  0xe2 PF: > { %s610_s5 = sand.u32 1, %s1117_s15   ;;  %p898_p0 = pnand %p738_p6, %p1246_p7 }
  0xe3   : > { %s611_s2 = scalar_lea.sflag [#allocation4], %s610_s5 }
  0xe4   : > { %p899_p2 = pneg %p898_p0 }
  0xe6   : > { %1112 = dma.done.wait (%p899_p2), %s611_s2, 128  }
  0xe7   : > { %1114 = vsyncadd (%p899_p2), %s611_s2, 4294967168  ;;  %s23_s20 = sadd.s32 1, %s1137_s20   ;;  %s1348_s17 = sld [smem:[#allocation13_spill]] }
  0xe8   : > { %p20_p5 = scmp.ge.s32.totalorder %s23_s20, 4   ;;  %s1349_s10 = sld [smem:[#allocation16_spill]] }
  0xe9   : > { %s1350_s18 = sld [smem:[#allocation14_spill]]  ;;  %s1352_s15 = smov %s1121_s16 }
  0xea   : > { %s1351_s19 = sld [smem:[#allocation15_spill]]  ;;  %22 = sbr.rel (!%p20_p5) target bundleno = 10 (0xa), region = 102 }
  0xed   : > { %s1353_s16 = smov %s1348_s17 }
  0xee   : > { %s1354_s17 = smov %s1349_s10 }
  0xef   :  { %617 = vsyncpa [#allocation3], 1 }
  0xf0   :  { %619 = vsyncpa [#allocation3 + $0x1], 1 }
  0xf1   :  { %620 = vsyncpa [#allocation6], 1 }
  0xf2   :  { %622 = vsyncpa [#allocation6 + $0x1], 1 }
  0xf3   :  { %623 = vsyncpa [#allocation4], 1 }
  0xf4   :  { %625 = vsyncpa [#allocation4 + $0x1], 1 }

</bundles_post_ra>
